<compile_context>
chip_gen: v6e
topology: v6e:2x2x1
jax: 0.10.0
libtpu: 0.0.40
codegen_flags: <defaults>
</compile_context>

<pallas_src>
import jax
import jax.numpy as jnp
from jax.experimental import pallas as pl
from jax.experimental.pallas import tpu as pltpu


def _normalize_kernel(x_ref, mean_ref, inv_ref, o_ref):
    # x_ref / o_ref: (row_block, col_block) VMEM tiles.
    # mean_ref / inv_ref: (row_block, 1) f32 per-row params, broadcast over lanes.
    x = x_ref[...].astype(jnp.float32)
    x = jnp.clip(x, 0.0, 1.0)
    o_ref[...] = ((x - mean_ref[...]) * inv_ref[...]).astype(o_ref.dtype)


def _pick_block(dim, align, cap):
    """Largest b <= cap with b % align == 0 and dim % b == 0; else the full dim.

    Full-dim blocks are exempt from the (8, 128) alignment rule, so the fallback
    is always a legal block shape.
    """
    cap = max(cap, align)
    b = (min(dim, cap) // align) * align
    while b >= align:
        if dim % b == 0:
            return b
        b -= align
    return dim


def _default_block_bytes():
    """Chip-aware block byte budget (per input block)."""
    try:
        kind = jax.devices()[0].device_kind.lower()
    except Exception:  # pragma: no cover - conservative fallback
        kind = ""
    if "v7" in kind or "tpu7" in kind:
        # 3.2 TB/s HBM per TC: per-step overhead dominates at small tiles.
        return 6 << 20
    if "v5 lite" in kind or "v5e" in kind or "v5lite" in kind:
        # 16 MiB default scoped VMEM; already near roofline at ~2 MiB tiles.
        return 2 << 20
    if "v6" in kind:
        return 3 << 20
    return 2 << 20


def input_normalize(x, new_mean, new_std, *, target_block_bytes=None):
    """x: (B, C, H, W); new_mean/new_std: (C,). Returns clamp(x,0,1) normalized."""
    B, C, H, W = x.shape
    R, L = B * C, H * W
    itemsize = jnp.dtype(x.dtype).itemsize
    # Native sublane packing height: 8 for f32, 16 for bf16, 32 for int8/fp8.
    row_align = max(8, 32 // itemsize)
    block_bytes = int(target_block_bytes) if target_block_bytes else _default_block_bytes()

    # Free reshape for contiguous NCHW; row r corresponds to channel r % C.
    xf = x.reshape(R, L)
    Lp = L
    if L % 128 != 0:
        # Keep stores lane-dense (unmasked vst) by padding the lane axis; padded
        # lanes are sliced off after the kernel.
        Lp = pl.cdiv(L, 128) * 128
        xf = jnp.pad(xf, ((0, 0), (0, Lp - L)))

    # Column block: prefer the full row (one contiguous DMA run per block) if a
    # row_align-row slab fits the budget; else a 128-multiple divisor of Lp.
    if Lp * itemsize * row_align <= block_bytes:
        col_block = Lp
    else:
        col_block = _pick_block(Lp, 128, max(128, block_bytes // (itemsize * row_align)))

    target_rows = max(row_align, block_bytes // (col_block * itemsize))
    row_block = _pick_block(R, row_align, target_rows)

    # Keep >= 2 grid steps when possible so both TensorCores get work on v7x
    # (neutral on v5e/v6e single-TC chips).
    if (R // row_block) * (Lp // col_block) < 2 and row_block == R \
            and R % row_align == 0 and R >= 2 * row_align:
        cand = _pick_block(R, row_align, (R // 2 // row_align) * row_align)
        if cand < R:
            row_block = cand

    grid = (R // row_block, Lp // col_block)

    # Per-row params stay in f32; kernel computes in f32 and casts on store.
    mean_rows = jnp.tile(new_mean.astype(jnp.float32), B).reshape(R, 1)
    inv_rows = jnp.tile(1.0 / new_std.astype(jnp.float32), B).reshape(R, 1)

    blk_bytes = row_block * col_block * itemsize
    # in + out, double-buffered (~4x block) plus headroom; stays under v7x's
    # 64 MiB physical VMEM and is a no-op raise on v5e/v6e (128 MiB physical).
    vmem_limit = int(min(max(6 * blk_bytes + (2 << 20), 16 << 20), 40 << 20))

    out = pl.pallas_call(
        _normalize_kernel,
        out_shape=jax.ShapeDtypeStruct((R, Lp), x.dtype),
        grid_spec=pltpu.PrefetchScalarGridSpec(
            num_scalar_prefetch=0,
            grid=grid,
            in_specs=[
                pl.BlockSpec((row_block, col_block), lambda i, j: (i, j)),
                pl.BlockSpec((row_block, 1), lambda i, j: (i, 0)),
                pl.BlockSpec((row_block, 1), lambda i, j: (i, 0)),
            ],
            out_specs=pl.BlockSpec((row_block, col_block), lambda i, j: (i, j)),
        ),
        compiler_params=pltpu.CompilerParams(
            dimension_semantics=("parallel", "parallel"),
            vmem_limit_bytes=vmem_limit,
        ),
    )(xf, mean_rows, inv_rows)

    if Lp != L:
        out = out[:, :L]
    return out.reshape(B, C, H, W)


def input_normalize_ref(x, new_mean, new_std):
    # Pure-JAX reference mirroring the PyTorch forward (true divide).
    x = jnp.clip(x, 0.0, 1.0)
    return (x - new_mean[None, :, None, None]) / new_std[None, :, None, None]


def _check(x, mean, std, *, atol=1e-5, rtol=1e-5, **kw):
    out = jax.block_until_ready(input_normalize(x, mean, std, **kw))
    # Reference computed in f32 (kernel does its math in f32 and casts on store;
    # (x - m) * (1/s) vs true divide -> ~1 ulp slack for f32 inputs).
    ref = input_normalize_ref(x.astype(jnp.float32), mean, std)
    assert out.shape == x.shape and out.dtype == x.dtype
    assert jnp.allclose(out.astype(jnp.float32), ref, atol=atol, rtol=rtol), \
        "mismatch vs reference"


if __name__ == "__main__":
    key = jax.random.PRNGKey(0)

    mean4 = jnp.array([0.485, 0.456, 0.406, 0.500], dtype=jnp.float32)
    std4 = jnp.array([0.229, 0.224, 0.225, 0.250], dtype=jnp.float32)
    k0, k1, k2, k3, k4 = jax.random.split(key, 5)

    # Main case: B=2, C=4, spatial 16x16; inputs slightly outside [0,1] so the
    # clamp matters.
    x_main = jax.random.uniform(k0, (2, 4, 16, 16), jnp.float32, -0.2, 1.2)
    _check(x_main, mean4, std4)

    # Larger case: row axis split into >=2 blocks (megacore path).
    mean8 = jax.random.uniform(k1, (8,), jnp.float32, 0.3, 0.7)
    std8 = jax.random.uniform(k1, (8,), jnp.float32, 0.2, 0.4)
    x_big = jax.random.uniform(k1, (4, 8, 64, 64), jnp.float32, -0.2, 1.2)
    _check(x_big, mean8, std8)

    # Small block budget -> multi-block grid along BOTH axes.
    x_rows = jax.random.uniform(k2, (4, 4, 32, 32), jnp.float32, -0.2, 1.2)
    _check(x_rows, mean4, std4, target_block_bytes=16 * 1024)

    # H*W not a multiple of 128 -> lane-padded path (stores stay unmasked).
    mean3 = jnp.array([0.485, 0.456, 0.406], dtype=jnp.float32)
    std3 = jnp.array([0.229, 0.224, 0.225], dtype=jnp.float32)
    x_odd = jax.random.uniform(k3, (2, 3, 10, 10), jnp.float32, -0.2, 1.2)
    _check(x_odd, mean3, std3)

    # bf16 inputs: f32 internal compute, 16-row sublane alignment.
    x_bf16 = jax.random.uniform(k4, (2, 8, 32, 32), jnp.float32, -0.2, 1.2).astype(jnp.bfloat16)
    _check(x_bf16, mean8, std8, atol=2e-2, rtol=2e-2)

    print("KERNEL_OK")
</pallas_src>

<mosaic_0001>
module attributes {stable_mosaic.version = 11 : i64} {
  func.func @_normalize_kernel(%arg0: i32, %arg1: i32, %arg2: memref<8x256xf32, #tpu.memory_space<vmem>>, %arg3: memref<8x1xf32, #tpu.memory_space<vmem>>, %arg4: memref<8x1xf32, #tpu.memory_space<vmem>>, %arg5: memref<8x256xf32, #tpu.memory_space<vmem>>) attributes {dimension_semantics = [#tpu.dimension_semantics<parallel>, #tpu.dimension_semantics<parallel>], iteration_bounds = array<i64: 1, 1>, scalar_prefetch = 0 : i64, scratch_operands = 0 : i64, tpu.core_type = #tpu.core_type<tc>, window_params = [{transform_indices = @transform_0, window_bounds = array<i64: 8, 256>}, {transform_indices = @transform_1, window_bounds = array<i64: 8, 1>}, {transform_indices = @transform_2, window_bounds = array<i64: 8, 1>}, {transform_indices = @transform_3, window_bounds = array<i64: 8, 256>}]} {
    %c0 = arith.constant 0 : index
    %c0_0 = arith.constant 0 : index
    %0 = vector.load %arg2[%c0, %c0_0] : memref<8x256xf32, #tpu.memory_space<vmem>>, vector<8x256xf32>
    %cst = arith.constant 0.000000e+00 : f32
    %cst_1 = arith.constant 1.000000e+00 : f32
    %1 = vector.broadcast %cst : f32 to vector<8x256xf32>
    %2 = arith.maximumf %1, %0 : vector<8x256xf32>
    %3 = vector.broadcast %cst_1 : f32 to vector<8x256xf32>
    %4 = arith.minimumf %3, %2 : vector<8x256xf32>
    %c0_2 = arith.constant 0 : index
    %c0_3 = arith.constant 0 : index
    %5 = vector.load %arg3[%c0_2, %c0_3] : memref<8x1xf32, #tpu.memory_space<vmem>>, vector<8x1xf32>
    %6 = vector.broadcast %5 : vector<8x1xf32> to vector<8x256xf32>
    %7 = arith.subf %4, %6 : vector<8x256xf32>
    %c0_4 = arith.constant 0 : index
    %c0_5 = arith.constant 0 : index
    %8 = vector.load %arg4[%c0_4, %c0_5] : memref<8x1xf32, #tpu.memory_space<vmem>>, vector<8x1xf32>
    %9 = vector.broadcast %8 : vector<8x1xf32> to vector<8x256xf32>
    %10 = arith.mulf %7, %9 : vector<8x256xf32>
    %c0_6 = arith.constant 0 : index
    %c0_7 = arith.constant 0 : index
    %11 = vector.load %arg5[%c0_6, %c0_7] : memref<8x256xf32, #tpu.memory_space<vmem>>, vector<8x256xf32>
    tpu.vector_store %arg5[%c0_6, %c0_7], %10 {strides = array<i32>} : memref<8x256xf32, #tpu.memory_space<vmem>>, vector<8x256xf32>,
    return
  }
  func.func @transform_0(%arg0: i32, %arg1: i32) -> (i32, i32) {
    %c0_i32 = arith.constant 0 : i32
    return %arg0, %arg1 : i32, i32
  }
  func.func @transform_1(%arg0: i32, %arg1: i32) -> (i32, i32) {
    %c0_i32 = arith.constant 0 : i32
    %c0_i32_0 = arith.constant 0 : i32
    return %arg0, %c0_i32 : i32, i32
  }
  func.func @transform_2(%arg0: i32, %arg1: i32) -> (i32, i32) {
    %c0_i32 = arith.constant 0 : i32
    %c0_i32_0 = arith.constant 0 : i32
    return %arg0, %c0_i32 : i32, i32
  }
  func.func @transform_3(%arg0: i32, %arg1: i32) -> (i32, i32) {
    %c0_i32 = arith.constant 0 : i32
    return %arg0, %arg1 : i32, i32
  }
}

</mosaic_0001>

<bundles_post_ra>
// kernel: tpu_custom_call.1
= control target key start
LH: loop header
LB: loop body
LE: loop exit
PB: predicated region body
PF: predicated region fallthrough
CT: control target
= control target key end

     0   :  { %v78_v1 = vmov 0   ;;  %s115_s0 = inlined_call_operand.vmem [shape: f32[8,256], index: 0, kind: input, shape index: {}]   ;;  %s116_s1 = inlined_call_operand.vmem [shape: f32[8,1], index: 1, kind: input, shape index: {}]   ;;  %s117_s2 = inlined_call_operand.vmem [shape: f32[8,1], index: 2, kind: input, shape index: {}]   ;;  %s118_s3 = inlined_call_operand.hbm [shape: f32[8,256], index: 3, kind: output, shape index: {}]  }
   0x1   :  { %v21_v0 = vld [vmem:[%s116_s1] sm:$0xff]  ;;  %55 = vset.pattern.permute.xlu0 %v78_v1 }
   0x2   :  { %8 = vsyncpa [#allocation3], 0  ;;  %24 = vperm.xlu0 %55, %v21_v0   ;;  %v29_v2 = vld [vmem:[%s117_s2] sm:$0xff]  ;;  %v16_v4 = vld [vmem:[%s115_s0 + $0x8] sm:$0xff]  ;;  %s79_s1 = smov [#allocation2]  }
   0x3   :  { %v15_v3 = vld [vmem:[%s115_s0] sm:$0xff]  ;;  %v18_v6 = vmax.f32 %v16_v4, 0.0  ;;  %s45_s20 = sshll.u32 %s79_s1, 4  ;;  %s46_s20 = int_to_ptr.vmem [resolvable:$true] %s45_s20 }
   0x4   :  { %v17_v5 = vmax.f32 %v15_v3, 0.0  ;;  %s56_s2 = scalar_lea.vmem %s46_s20, 256  ;;  %p61_p1 = scmp.lt.s32.totalorder %s46_s20, %s46_s20 }
   0x5   :  { %v20_v8 = vmin.f32 %v18_v6, 1.0  ;;  %p57_p0 = scmp.ne.s32.totalorder %s46_s20, %s56_s2  ;;  %p62_p2 = scmp.lt.s32.totalorder %s56_s2, %s56_s2 }
   0x6   :  { %32 = vperm.xlu0 %55, %v29_v2   ;;  %v19_v7 = vmin.f32 %v17_v5, 1.0 }
   0x7   :  { %p63_p3 = por %p62_p2, %p61_p1 }
   0x9   :  { %p64_p4 = pnand %p63_p3, %p57_p0 }
  0x7d   :  { %v25_v9 = vpop.permute.xlu0 %24 }
  0x7e   :  { %v27_v10 = vsub.f32 %v19_v7, %v25_v9  ;;  %v28_v11 = vsub.f32 %v20_v8, %v25_v9 }
  0x81   :  { %v33_v12 = vpop.permute.xlu0 %32 }
  0x82   :  { %v35_v13 = vmul.f32 %v33_v12, %v27_v10  ;;  %v36_v14 = vmul.f32 %v33_v12, %v28_v11 }
  0x84   :  { %37 = vst [vmem:[#allocation2] sm:$0xff] %v35_v13  ;;  %38 = vst [vmem:[#allocation2 + $0x8] sm:$0xff] %v36_v14 }
  0x85   :  { %67 = shalt.err (!%p64_p4)
}
  0x86   :  { %48 = dma.vmem_to_hbm [thread:$0]  %s46_s20, 256, %s118_s3, [#allocation3]  }
  0x87   :  { %76 = dma.done.wait [#allocation3], 256  }
  0x88   :  { %77 = vsyncadd [#allocation3], 4294967040 }
  0x89   :  { %52 = vsyncpa [#allocation3], 1 }

</bundles_post_ra>
